<compile_context>
chip_gen: v5e
topology: v5e:2x2
jax: 0.10.0
libtpu: 0.0.40
codegen_flags: <defaults>
</compile_context>

<pallas_src>
import functools

import jax
import jax.numpy as jnp
from jax.experimental import pallas as pl
from jax.experimental.pallas import tpu as pltpu


def _round_up(x, m):
    return ((x + m - 1) // m) * m


# Minimum per-grid-step tile before we force a >=2-step grid (v7x megacore).
_MIN_TILE_FOR_SPLIT = 512


def _choose_tile_b(batch, requested):
    """Pick a batch tile: large (overhead-amortizing), sublane-aligned, and
    split into >=2 grid steps once each half-tile is still big enough."""
    b8 = _round_up(batch, 8)
    tile = max(8, min(_round_up(requested, 8), b8))
    if b8 >= 2 * _MIN_TILE_FOR_SPLIT:
        # Guarantee >=2 "parallel" grid steps so v7x's second TensorCore is
        # used. TODO(synk): if a v7x profile still shows one idle TC, switch
        # the batch axis to pltpu.CORE_PARALLEL.
        tile = min(tile, _round_up(-(-batch // 2), 8))
    return tile


def disagreement_kernel(obs_ref, act_ref, next_obs_ref,
                        w1_ref, b1_ref, w2_ref, b2_ref, rep_ref, sel_ref,
                        out_ref, x_ref):
    """One batch tile of the fused ensemble forward.

    obs_ref:      (TILE_B, obs_dim)
    act_ref:      (TILE_B, action_dim)
    next_obs_ref: (TILE_B, pred_dim)
    w1_ref:       (in_dim, H_pad)               fused layer-1 weights
    b1_ref:       (1, H_pad)                    fused layer-1 bias
    w2_ref:       (H_pad, n_models*pred_dim)    block-diagonal layer-2 weights
    b2_ref:       (1, n_models*pred_dim)        fused layer-2 bias
    rep_ref:      (pred_dim, n_models*pred_dim) 0/1 replication matrix
    sel_ref:      (n_models*pred_dim, n_models) 0/1 per-model selection matrix
    out_ref:      (TILE_B, n_models)
    x_ref:        (TILE_B, in_dim)              VMEM scratch for concat(obs, act)
    """
    obs_dim = obs_ref.shape[-1]
    act_dim = act_ref.shape[-1]

    # Stitch x = concat([obs, action], -1) in VMEM with two masked stores, so
    # layer 1 is a single merged-K MXU matmul (one fewer vmatmul push chain).
    x_ref[:, 0:obs_dim] = obs_ref[...]
    x_ref[:, obs_dim:obs_dim + act_dim] = act_ref[...]

    # Fused layer 1: one wide MXU matmul + fused bias + ReLU.
    h = jnp.dot(x_ref[...], w1_ref[...], preferred_element_type=jnp.float32)
    h = jnp.maximum(h + b1_ref[...], 0.0)                       # (TILE_B, H_pad)

    # Fused layer 2: block-diagonal weights -> all model predictions at once.
    pred = jnp.dot(h, w2_ref[...], preferred_element_type=jnp.float32)
    pred = pred + b2_ref[...]                                    # (TILE_B, NM*PD)

    # Replicate next_obs across models on the MXU (avoids XLU lane tiling).
    nxt_rep = jnp.dot(next_obs_ref[...], rep_ref[...],
                      preferred_element_type=jnp.float32)        # (TILE_B, NM*PD)

    # Per-model L2: square the diff, reduce each pred_dim segment with a 0/1
    # selection-matrix matmul (rides the MXU instead of the XLU), then sqrt.
    diff = nxt_rep - pred
    err2 = jnp.dot(diff * diff, sel_ref[...],
                   preferred_element_type=jnp.float32)           # (TILE_B, NM)
    out_ref[...] = jnp.sqrt(err2)


def prepare_fused_params(params, *, hidden_pad_to=128):
    """Build the fused/padded weight layout ONCE (not per call)."""
    w1, b1, w2, b2 = params
    n_models, in_dim, hidden = w1.shape
    pred_dim = w2.shape[-1]
    H = n_models * hidden
    H_pad = _round_up(H, hidden_pad_to)
    P = n_models * pred_dim

    # Layer 1 fused: (in_dim, H_pad); columns m*hidden:(m+1)*hidden == w1[m].
    w1_wide = jnp.transpose(w1, (1, 0, 2)).reshape(in_dim, H).astype(jnp.float32)
    w1_wide = jnp.pad(w1_wide, ((0, 0), (0, H_pad - H)))
    b1_wide = jnp.pad(b1.reshape(1, H).astype(jnp.float32),
                      ((0, 0), (0, H_pad - H)))

    # Layer 2 block-diagonal: (H_pad, P). Padded hidden rows are zero.
    w2_bd = jax.scipy.linalg.block_diag(*[w2[m] for m in range(n_models)])
    w2_bd = jnp.pad(w2_bd.astype(jnp.float32), ((0, H_pad - H), (0, 0)))
    b2_wide = b2.reshape(1, P).astype(jnp.float32)

    # Replication matrix: (pred_dim, P), rep[j, m*pred_dim + j] = 1.
    rep = jnp.tile(jnp.eye(pred_dim, dtype=jnp.float32), (1, n_models))
    # Per-model selection matrix: (P, n_models), sel[m*pred_dim + j, m] = 1.
    sel = jnp.repeat(jnp.eye(n_models, dtype=jnp.float32), pred_dim, axis=0)

    return w1_wide, b1_wide, w2_bd, b2_wide, rep, sel


@functools.partial(jax.jit, static_argnames=("tile_b",))
def disagreement_forward(obs, action, next_obs, fused_params, *, tile_b=2048):
    """Run the fused Pallas kernel over a batch grid."""
    w1_wide, b1_wide, w2_bd, b2_wide, rep, sel = fused_params
    assert obs.shape[0] == next_obs.shape[0]
    assert obs.shape[0] == action.shape[0]

    obs = obs.astype(jnp.float32)
    action = action.astype(jnp.float32)
    next_obs = next_obs.astype(jnp.float32)

    B = obs.shape[0]
    obs_dim = obs.shape[1]
    action_dim = action.shape[1]
    pred_dim = next_obs.shape[1]
    in_dim = obs_dim + action_dim
    n_models = sel.shape[1]
    h_pad = w1_wide.shape[1]
    p_wide = w2_bd.shape[1]

    tb = _choose_tile_b(B, tile_b)
    b_pad = _round_up(B, tb)
    if b_pad != B:
        pad = ((0, b_pad - B), (0, 0))
        obs = jnp.pad(obs, pad)
        action = jnp.pad(action, pad)
        next_obs = jnp.pad(next_obs, pad)
    grid = (b_pad // tb,)

    batch_spec = lambda feat: pl.BlockSpec((tb, feat), lambda i: (i, 0))
    # Constant index_map -> the pipeline keeps these VMEM-resident (no re-DMA
    # across grid steps). Their total footprint is ~0.2 MiB, so the extra
    # double buffer is negligible and we skip pl.Buffered(1) to stay simple.
    resident = lambda shape: pl.BlockSpec(shape, lambda i: (0, 0))

    out = pl.pallas_call(
        disagreement_kernel,
        out_shape=jax.ShapeDtypeStruct((b_pad, n_models), jnp.float32),
        grid=grid,
        in_specs=[
            batch_spec(obs_dim),             # obs
            batch_spec(action_dim),          # action
            batch_spec(pred_dim),            # next_obs
            resident((in_dim, h_pad)),       # fused W1
            resident((1, h_pad)),            # fused b1
            resident((h_pad, p_wide)),       # block-diagonal W2
            resident((1, p_wide)),           # fused b2
            resident((pred_dim, p_wide)),    # replication matrix
            resident((p_wide, n_models)),    # selection matrix
        ],
        # NOTE: output last dim (n_models) is intentionally NOT padded to 128
        # lanes; output traffic is tiny and padding would inflate HBM writes.
        out_specs=batch_spec(n_models),
        scratch_shapes=[pltpu.VMEM((tb, in_dim), jnp.float32)],
        compiler_params=pltpu.CompilerParams(
            dimension_semantics=("parallel",),
            # Big batch tiles need more than v5e's 16 MiB default scoped VMEM;
            # ~48 MiB still leaves headroom on every generation (incl. v7x).
            vmem_limit_bytes=48 * 1024 * 1024,
        ),
    )(obs, action, next_obs, w1_wide, b1_wide, w2_bd, b2_wide, rep, sel)

    return out[:B]


def init_params(key, obs_dim, action_dim, hidden_dim, n_models, pred_dim):
    """Deterministic synthetic init for the ensemble of 2-layer MLPs."""
    in_dim = obs_dim + action_dim
    k1, k2, k3, k4 = jax.random.split(key, 4)
    s1 = 1.0 / jnp.sqrt(jnp.float32(in_dim))
    s2 = 1.0 / jnp.sqrt(jnp.float32(hidden_dim))
    w1 = jax.random.uniform(k1, (n_models, in_dim, hidden_dim), jnp.float32, -s1, s1)
    b1 = jax.random.uniform(k2, (n_models, hidden_dim), jnp.float32, -s1, s1)
    w2 = jax.random.uniform(k3, (n_models, hidden_dim, pred_dim), jnp.float32, -s2, s2)
    b2 = jax.random.uniform(k4, (n_models, pred_dim), jnp.float32, -s2, s2)
    return w1, b1, w2, b2


def disagreement_reference(obs, action, next_obs, params):
    """Pure-JAX reference of the PyTorch forward for validation."""
    w1, b1, w2, b2 = params
    x = jnp.concatenate([obs, action], axis=-1)
    hi = jax.lax.Precision.HIGHEST
    errs = []
    for m in range(w1.shape[0]):
        h = jnp.maximum(jnp.dot(x, w1[m], precision=hi) + b1[m], 0.0)
        pred = jnp.dot(h, w2[m], precision=hi) + b2[m]
        errs.append(jnp.linalg.norm(next_obs - pred, axis=-1, keepdims=True))
    return jnp.concatenate(errs, axis=1)


if __name__ == "__main__":
    # Small shapes consistent with the module's forward.
    obs_dim, action_dim, hidden_dim, n_models = 16, 8, 32, 5
    pred_dim = obs_dim  # pred_dim defaults to obs_dim in the module

    key = jax.random.PRNGKey(0)
    k_obs, k_act, k_next, k_params = jax.random.split(key, 4)
    params = init_params(k_params, obs_dim, action_dim, hidden_dim, n_models, pred_dim)
    fused = prepare_fused_params(params)  # built once, reused per call

    # --- Test 1: tiny batch (module-scale), single grid step. ---
    B = 8
    obs = jax.random.normal(k_obs, (B, obs_dim), jnp.float32)
    action = jax.random.normal(k_act, (B, action_dim), jnp.float32)
    next_obs = jax.random.normal(k_next, (B, obs_dim), jnp.float32)

    out = jax.block_until_ready(disagreement_forward(obs, action, next_obs, fused))
    ref = disagreement_reference(obs, action, next_obs, params)
    assert out.shape == (B, n_models), out.shape
    assert jnp.allclose(out, ref, atol=1e-4, rtol=1e-4), "mismatch vs reference (B=8)"

    # --- Test 2: non-aligned batch with a small forced tile -> multi-step
    #             "parallel" grid + batch padding path. ---
    B2 = 300
    k2o, k2a, k2n = jax.random.split(jax.random.PRNGKey(1), 3)
    obs2 = jax.random.normal(k2o, (B2, obs_dim), jnp.float32)
    action2 = jax.random.normal(k2a, (B2, action_dim), jnp.float32)
    next_obs2 = jax.random.normal(k2n, (B2, obs_dim), jnp.float32)

    out2 = jax.block_until_ready(
        disagreement_forward(obs2, action2, next_obs2, fused, tile_b=128))
    ref2 = disagreement_reference(obs2, action2, next_obs2, params)
    assert out2.shape == (B2, n_models), out2.shape
    assert jnp.allclose(out2, ref2, atol=1e-4, rtol=1e-4), "mismatch vs reference (B=300)"

    print("KERNEL_OK")
</pallas_src>

<mosaic_0001>
module attributes {stable_mosaic.version = 11 : i64} {
  func.func @disagreement_kernel(%arg0: i32, %arg1: memref<8x16xf32, #tpu.memory_space<vmem>>, %arg2: memref<8x8xf32, #tpu.memory_space<vmem>>, %arg3: memref<8x16xf32, #tpu.memory_space<vmem>>, %arg4: memref<24x256xf32, #tpu.memory_space<vmem>>, %arg5: memref<1x256xf32, #tpu.memory_space<vmem>>, %arg6: memref<256x80xf32, #tpu.memory_space<vmem>>, %arg7: memref<1x80xf32, #tpu.memory_space<vmem>>, %arg8: memref<16x80xf32, #tpu.memory_space<vmem>>, %arg9: memref<80x5xf32, #tpu.memory_space<vmem>>, %arg10: memref<8x5xf32, #tpu.memory_space<vmem>>, %arg11: memref<8x24xf32, #tpu.memory_space<vmem>>) attributes {dimension_semantics = [#tpu.dimension_semantics<parallel>], iteration_bounds = array<i64: 1>, scalar_prefetch = 0 : i64, scratch_operands = 1 : i64, tpu.core_type = #tpu.core_type<tc>, window_params = [{transform_indices = @transform_0, window_bounds = array<i64: 8, 16>}, {transform_indices = @transform_1, window_bounds = array<i64: 8, 8>}, {transform_indices = @transform_2, window_bounds = array<i64: 8, 16>}, {pipeline_mode = #tpu.pipeline_mode<synchronous>, transform_indices = @transform_3, window_bounds = array<i64: 24, 256>}, {pipeline_mode = #tpu.pipeline_mode<synchronous>, transform_indices = @transform_4, window_bounds = array<i64: 1, 256>}, {pipeline_mode = #tpu.pipeline_mode<synchronous>, transform_indices = @transform_5, window_bounds = array<i64: 256, 80>}, {pipeline_mode = #tpu.pipeline_mode<synchronous>, transform_indices = @transform_6, window_bounds = array<i64: 1, 80>}, {pipeline_mode = #tpu.pipeline_mode<synchronous>, transform_indices = @transform_7, window_bounds = array<i64: 16, 80>}, {pipeline_mode = #tpu.pipeline_mode<synchronous>, transform_indices = @transform_8, window_bounds = array<i64: 80, 5>}, {transform_indices = @transform_9, window_bounds = array<i64: 8, 5>}]} {
    %c0 = arith.constant 0 : index
    %c0_0 = arith.constant 0 : index
    %0 = vector.load %arg1[%c0, %c0_0] : memref<8x16xf32, #tpu.memory_space<vmem>>, vector<8x16xf32>
    %c0_1 = arith.constant 0 : index
    %c0_2 = arith.constant 0 : index
    %1 = vector.load %arg11[%c0_1, %c0_2] : memref<8x24xf32, #tpu.memory_space<vmem>>, vector<8x16xf32>
    tpu.vector_store %arg11[%c0_1, %c0_2], %0 {strides = array<i32>} : memref<8x24xf32, #tpu.memory_space<vmem>>, vector<8x16xf32>,
    %c0_3 = arith.constant 0 : index
    %c0_4 = arith.constant 0 : index
    %2 = vector.load %arg2[%c0_3, %c0_4] : memref<8x8xf32, #tpu.memory_space<vmem>>, vector<8x8xf32>
    %c0_5 = arith.constant 0 : index
    %c16 = arith.constant 16 : index
    %3 = vector.load %arg11[%c0_5, %c16] : memref<8x24xf32, #tpu.memory_space<vmem>>, vector<8x8xf32>
    tpu.vector_store %arg11[%c0_5, %c16], %2 {strides = array<i32>} : memref<8x24xf32, #tpu.memory_space<vmem>>, vector<8x8xf32>,
    %c0_6 = arith.constant 0 : index
    %c0_7 = arith.constant 0 : index
    %4 = vector.load %arg11[%c0_6, %c0_7] : memref<8x24xf32, #tpu.memory_space<vmem>>, vector<8x24xf32>
    %c0_8 = arith.constant 0 : index
    %c0_9 = arith.constant 0 : index
    %5 = vector.load %arg4[%c0_8, %c0_9] : memref<24x256xf32, #tpu.memory_space<vmem>>, vector<24x256xf32>
    %cst = arith.constant dense<0.000000e+00> : vector<8x256xf32>
    %6 = tpu.matmul %4, %5, %cst {dimension_numbers = #tpu.dot_dimension_numbers<[1], [0], [0], [1], [0, 0, 1, 1], [], []>} : vector<8x24xf32>, vector<24x256xf32>, vector<8x256xf32> -> vector<8x256xf32>
    %c0_10 = arith.constant 0 : index
    %c0_11 = arith.constant 0 : index
    %7 = vector.load %arg5[%c0_10, %c0_11] : memref<1x256xf32, #tpu.memory_space<vmem>>, vector<1x256xf32>
    %8 = vector.broadcast %7 : vector<1x256xf32> to vector<8x256xf32>
    %9 = arith.addf %6, %8 : vector<8x256xf32>
    %cst_12 = arith.constant 0.000000e+00 : f32
    %10 = vector.broadcast %cst_12 : f32 to vector<8x256xf32>
    %11 = arith.maximumf %9, %10 : vector<8x256xf32>
    %c0_13 = arith.constant 0 : index
    %c0_14 = arith.constant 0 : index
    %12 = vector.load %arg6[%c0_13, %c0_14] : memref<256x80xf32, #tpu.memory_space<vmem>>, vector<256x80xf32>
    %cst_15 = arith.constant dense<0.000000e+00> : vector<8x80xf32>
    %13 = tpu.matmul %11, %12, %cst_15 {dimension_numbers = #tpu.dot_dimension_numbers<[1], [0], [0], [1], [0, 0, 1, 1], [], []>} : vector<8x256xf32>, vector<256x80xf32>, vector<8x80xf32> -> vector<8x80xf32>
    %c0_16 = arith.constant 0 : index
    %c0_17 = arith.constant 0 : index
    %14 = vector.load %arg7[%c0_16, %c0_17] : memref<1x80xf32, #tpu.memory_space<vmem>>, vector<1x80xf32>
    %15 = vector.broadcast %14 : vector<1x80xf32> to vector<8x80xf32>
    %16 = arith.addf %13, %15 : vector<8x80xf32>
    %c0_18 = arith.constant 0 : index
    %c0_19 = arith.constant 0 : index
    %17 = vector.load %arg3[%c0_18, %c0_19] : memref<8x16xf32, #tpu.memory_space<vmem>>, vector<8x16xf32>
    %c0_20 = arith.constant 0 : index
    %c0_21 = arith.constant 0 : index
    %18 = vector.load %arg8[%c0_20, %c0_21] : memref<16x80xf32, #tpu.memory_space<vmem>>, vector<16x80xf32>
    %cst_22 = arith.constant dense<0.000000e+00> : vector<8x80xf32>
    %19 = tpu.matmul %17, %18, %cst_22 {dimension_numbers = #tpu.dot_dimension_numbers<[1], [0], [0], [1], [0, 0, 1, 1], [], []>} : vector<8x16xf32>, vector<16x80xf32>, vector<8x80xf32> -> vector<8x80xf32>
    %20 = arith.subf %19, %16 : vector<8x80xf32>
    %21 = arith.mulf %20, %20 : vector<8x80xf32>
    %c0_23 = arith.constant 0 : index
    %c0_24 = arith.constant 0 : index
    %22 = vector.load %arg9[%c0_23, %c0_24] : memref<80x5xf32, #tpu.memory_space<vmem>>, vector<80x5xf32>
    %cst_25 = arith.constant dense<0.000000e+00> : vector<8x5xf32>
    %23 = tpu.matmul %21, %22, %cst_25 {dimension_numbers = #tpu.dot_dimension_numbers<[1], [0], [0], [1], [0, 0, 1, 1], [], []>} : vector<8x80xf32>, vector<80x5xf32>, vector<8x5xf32> -> vector<8x5xf32>
    %24 = math.sqrt %23 : vector<8x5xf32>
    %c0_26 = arith.constant 0 : index
    %c0_27 = arith.constant 0 : index
    %25 = vector.load %arg10[%c0_26, %c0_27] : memref<8x5xf32, #tpu.memory_space<vmem>>, vector<8x5xf32>
    tpu.vector_store %arg10[%c0_26, %c0_27], %24 {strides = array<i32>} : memref<8x5xf32, #tpu.memory_space<vmem>>, vector<8x5xf32>,
    return
  }
  func.func @transform_0(%arg0: i32) -> (i32, i32) {
    %c0_i32 = arith.constant 0 : i32
    %c0_i32_0 = arith.constant 0 : i32
    return %arg0, %c0_i32 : i32, i32
  }
  func.func @transform_1(%arg0: i32) -> (i32, i32) {
    %c0_i32 = arith.constant 0 : i32
    %c0_i32_0 = arith.constant 0 : i32
    return %arg0, %c0_i32 : i32, i32
  }
  func.func @transform_2(%arg0: i32) -> (i32, i32) {
    %c0_i32 = arith.constant 0 : i32
    %c0_i32_0 = arith.constant 0 : i32
    return %arg0, %c0_i32 : i32, i32
  }
  func.func @transform_3(%arg0: i32) -> (i32, i32) {
    %c0_i32 = arith.constant 0 : i32
    %c0_i32_0 = arith.constant 0 : i32
    %c0_i32_1 = arith.constant 0 : i32
    return %c0_i32, %c0_i32_0 : i32, i32
  }
  func.func @transform_4(%arg0: i32) -> (i32, i32) {
    %c0_i32 = arith.constant 0 : i32
    %c0_i32_0 = arith.constant 0 : i32
    %c0_i32_1 = arith.constant 0 : i32
    return %c0_i32, %c0_i32_0 : i32, i32
  }
  func.func @transform_5(%arg0: i32) -> (i32, i32) {
    %c0_i32 = arith.constant 0 : i32
    %c0_i32_0 = arith.constant 0 : i32
    %c0_i32_1 = arith.constant 0 : i32
    return %c0_i32, %c0_i32_0 : i32, i32
  }
  func.func @transform_6(%arg0: i32) -> (i32, i32) {
    %c0_i32 = arith.constant 0 : i32
    %c0_i32_0 = arith.constant 0 : i32
    %c0_i32_1 = arith.constant 0 : i32
    return %c0_i32, %c0_i32_0 : i32, i32
  }
  func.func @transform_7(%arg0: i32) -> (i32, i32) {
    %c0_i32 = arith.constant 0 : i32
    %c0_i32_0 = arith.constant 0 : i32
    %c0_i32_1 = arith.constant 0 : i32
    return %c0_i32, %c0_i32_0 : i32, i32
  }
  func.func @transform_8(%arg0: i32) -> (i32, i32) {
    %c0_i32 = arith.constant 0 : i32
    %c0_i32_0 = arith.constant 0 : i32
    %c0_i32_1 = arith.constant 0 : i32
    return %c0_i32, %c0_i32_0 : i32, i32
  }
  func.func @transform_9(%arg0: i32) -> (i32, i32) {
    %c0_i32 = arith.constant 0 : i32
    %c0_i32_0 = arith.constant 0 : i32
    return %arg0, %c0_i32 : i32, i32
  }
}

</mosaic_0001>

<bundles_post_ra>
// kernel: disagreement_forward.1
= control target key start
LH: loop header
LB: loop body
LE: loop exit
PB: predicated region body
PF: predicated region fallthrough
CT: control target
= control target key end

     0   :  { %vm34_vm0 = vcmask 130048   ;;  %s305_s13 = smov 16   ;;  %s527_s0 = inlined_call_operand.vmem [shape: f32[8,16], index: 0, kind: input, shape index: {}]   ;;  %s528_s1 = inlined_call_operand.vmem [shape: f32[8,8], index: 1, kind: input, shape index: {}]   ;;  %s529_s2 = inlined_call_operand.vmem [shape: f32[8,16], index: 2, kind: input, shape index: {}]   ;;  %s530_s3 = inlined_call_operand.vmem [shape: f32[24,256], index: 3, kind: input, shape index: {}]   ;;  %s531_s4 = inlined_call_operand.vmem [shape: f32[1,256], index: 4, kind: input, shape index: {}]   ;;  %s532_s5 = inlined_call_operand.vmem [shape: f32[256,80], index: 5, kind: input, shape index: {}]   ;;  %s533_s6 = inlined_call_operand.vmem [shape: f32[1,80], index: 6, kind: input, shape index: {}]   ;;  %s534_s7 = inlined_call_operand.vmem [shape: f32[16,80], index: 7, kind: input, shape index: {}]   ;;  %s535_s8 = inlined_call_operand.vmem [shape: f32[80,5], index: 8, kind: input, shape index: {}]   ;;  %s536_s9 = inlined_call_operand.hbm [shape: f32[8,5], index: 9, kind: output, shape index: {}]  }
   0x1   :  { %v36_v0 = vld [vmem:[%s528_s1] sm:$0xff] }
   0x2   :  { %v33_v1 = vld [vmem:[%s527_s0] sm:$0xff]  ;;  %38 = vrot.lane.b32.xlu0 %v36_v0, %s305_s13 }
   0x3   :  { %35 = vst.msk [vmem:[#allocation2] sm:$0xff] %vm34_vm0, %v33_v1 }
   0x4   :  { %14 = vsyncpa [#allocation4], 0  ;;  %v48_v2 = vld [vmem:[%s530_s3 + $0x20] sm:$0xff]  ;;  %v49_v3 = vld [vmem:[%s530_s3 + $0x28] sm:$0xff]  ;;  %vm41_vm1 = vcmask 195712   ;;  %vm56_vm2 = vcmask 195584  }
   0x5   :  { %v46_v4 = vld [vmem:[%s530_s3 + $0x10] sm:$0xff]  ;;  %73 = vmatpush.msra.mxu0 %v48_v2  ;;  %93 = vmatpush.msra.mxu1 %v49_v3  ;;  %v47_v5 = vld [vmem:[%s530_s3 + $0x18] sm:$0xff]  ;;  %v44_v6 = vld [vmem:[%s530_s3] sm:$0xff]  ;;  %vm216_vm3 = vcmask 654336   ;;  %s261_s20 = sshll.u32 %s536_s9, 4  ;;  %vm252_vm5 = vcmask 39936   ;;  %s262_s20 = int_to_ptr.hbm [resolvable:$true] %s261_s20 }
   0x6   :  { %v45_v7 = vld [vmem:[%s530_s3 + $0x8] sm:$0xff]  ;;  %v117_v8 = vld [vmem:[%s532_s5 + $0x78] sm:$0xff]  ;;  %v116_v10 = vld [vmem:[%s532_s5 + $0x70] sm:$0xff] }
   0x7   :  { %74 = vmatpush.msra.mxu0 %v46_v4  ;;  %94 = vmatpush.msra.mxu1 %v47_v5  ;;  %v133_v9 = vld [vmem:[%s532_s5 + $0xf8] sm:$0xff]  ;;  %v132_v11 = vld [vmem:[%s532_s5 + $0xf0] sm:$0xff]  ;;  %v115_v12 = vld [vmem:[%s532_s5 + $0x68] sm:$0xff] }
   0x8   :  { %138 = vmatpush.msra.mxu2 %v117_v8  ;;  %158 = vmatpush.msra.mxu3 %v133_v9  ;;  %v131_v13 = vld [vmem:[%s532_s5 + $0xe8] sm:$0xff]  ;;  %v114_v14 = vld [vmem:[%s532_s5 + $0x60] sm:$0xff]  ;;  %v113_v16 = vld [vmem:[%s532_s5 + $0x58] sm:$0xff] }
   0x9   :  { %75 = vmatpush.msra.mxu0 %v44_v6  ;;  %95 = vmatpush.msra.mxu1 %v45_v7  ;;  %v130_v15 = vld [vmem:[%s532_s5 + $0xe0] sm:$0xff]  ;;  %v129_v17 = vld [vmem:[%s532_s5 + $0xd8] sm:$0xff]  ;;  %v112_v18 = vld [vmem:[%s532_s5 + $0x50] sm:$0xff] }
   0xa   :  { %139 = vmatpush.msra.mxu2 %v116_v10  ;;  %159 = vmatpush.msra.mxu3 %v132_v11  ;;  %v128_v19 = vld [vmem:[%s532_s5 + $0xd0] sm:$0xff]  ;;  %v111_v20 = vld [vmem:[%s532_s5 + $0x48] sm:$0xff]  ;;  %v110_v22 = vld [vmem:[%s532_s5 + $0x40] sm:$0xff] }
   0xb   :  { %v127_v21 = vld [vmem:[%s532_s5 + $0xc8] sm:$0xff]  ;;  %v126_v23 = vld [vmem:[%s532_s5 + $0xc0] sm:$0xff]  ;;  %v109_v24 = vld [vmem:[%s532_s5 + $0x38] sm:$0xff] }
   0xc   :  { %140 = vmatpush.msra.mxu2 %v115_v12  ;;  %160 = vmatpush.msra.mxu3 %v131_v13  ;;  %v125_v25 = vld [vmem:[%s532_s5 + $0xb8] sm:$0xff]  ;;  %v108_v26 = vld [vmem:[%s532_s5 + $0x30] sm:$0xff]  ;;  %v107_v28 = vld [vmem:[%s532_s5 + $0x28] sm:$0xff] }
   0xd   :  { %v124_v27 = vld [vmem:[%s532_s5 + $0xb0] sm:$0xff]  ;;  %v123_v29 = vld [vmem:[%s532_s5 + $0xa8] sm:$0xff]  ;;  %v106_v30 = vld [vmem:[%s532_s5 + $0x20] sm:$0xff] }
   0xe   :  { %141 = vmatpush.msra.mxu2 %v114_v14  ;;  %161 = vmatpush.msra.mxu3 %v130_v15  ;;  %v122_v31 = vld [vmem:[%s532_s5 + $0xa0] sm:$0xff]  ;;  %v105_v32 = vld [vmem:[%s532_s5 + $0x18] sm:$0xff]  ;;  %v104_v36 = vld [vmem:[%s532_s5 + $0x10] sm:$0xff] }
   0xf   :  { %v121_v33 = vld [vmem:[%s532_s5 + $0x98] sm:$0xff]  ;;  %v120_v37 = vld [vmem:[%s532_s5 + $0x90] sm:$0xff]  ;;  %v103_v38 = vld [vmem:[%s532_s5 + $0x8] sm:$0xff] }
  0x10   :  { %142 = vmatpush.msra.mxu2 %v113_v16  ;;  %162 = vmatpush.msra.mxu3 %v129_v17  ;;  %v119_v39 = vld [vmem:[%s532_s5 + $0x88] sm:$0xff]  ;;  %v102_v40 = vld [vmem:[%s532_s5] sm:$0xff]  ;;  %v213_v47 = vld [vmem:[%s535_s8 + $0x38] sm:$0xff] }
  0x11   :  { %v118_v41 = vld [vmem:[%s532_s5 + $0x80] sm:$0xff]  ;;  %v180_v42 = vld [vmem:[%s534_s7 + $0x8] sm:$0xff]  ;;  %v212_v48 = vld [vmem:[%s535_s8 + $0x30] sm:$0xff] }
  0x12   :  { %143 = vmatpush.msra.mxu2 %v112_v18  ;;  %163 = vmatpush.msra.mxu3 %v128_v19  ;;  %v179_v43 = vld [vmem:[%s534_s7] sm:$0xff]  ;;  %v215_v45 = vld [vmem:[%s535_s8 + $0x48] sm:$0xff]  ;;  %v209_v60 = vld [vmem:[%s535_s8 + $0x18] sm:$0xff] }
  0x13   :  { %198 = vmatpush.msrb.mxu0 %v180_v42  ;;  %v178_v44 = vld [vmem:[%s529_s2] sm:$0xff]  ;;  %226 = vmatpush.msrb.mxu1 %v215_v45  ;;  %v211_v49 = vld [vmem:[%s535_s8 + $0x28] sm:$0xff]  ;;  %v208_v61 = vld [vmem:[%s535_s8 + $0x10] sm:$0xff] }
  0x14   :  { %144 = vmatpush.msra.mxu2 %v111_v20  ;;  %164 = vmatpush.msra.mxu3 %v127_v21  ;;  %v214_v46 = vld [vmem:[%s535_s8 + $0x40] sm:$0xff]  ;;  %v207_v62 = vld [vmem:[%s535_s8 + $0x8] sm:$0xff] }
  0x15   :  { %199 = vmatpush.msrb.mxu0 %v179_v43  ;;  %227 = vmatpush.msrb.mxu1 %v214_v46  ;;  %v50_v50 = vld [vmem:[%s531_s4] sm:$0x3] }
  0x16   :  { %145 = vmatpush.msra.mxu2 %v110_v22  ;;  %165 = vmatpush.msra.mxu3 %v126_v23  ;;  %v52_v51 = vperm.slane %v50_v50, 0  ;;  %v53_v52 = vperm.slane %v50_v50, 1  ;;  %v210_v59 = vld [vmem:[%s535_s8 + $0x20] sm:$0xff] }
  0x17   :  { %228 = vmatpush.msrb.mxu1 %v213_v47  ;;  %v206_v63 = vld [vmem:[%s535_s8] sm:$0xff]  ;;  %s306_s8 = smov [#allocation3]  }
  0x18   :  { %146 = vmatpush.msra.mxu2 %v109_v24  ;;  %166 = vmatpush.msra.mxu3 %v125_v25  ;;  %v276_v0 = vld [vmem:[%s533_s6] ss:$0 sm:$0xff]  ;;  %s259_s0 = sshll.u32 %s306_s8, 4  ;;  %s260_s0 = int_to_ptr.vmem [resolvable:$true] %s259_s0 }
  0x19   :  { %229 = vmatpush.msrb.mxu1 %v212_v48 }
  0x1a   :  { %147 = vmatpush.msra.mxu2 %v108_v26  ;;  %167 = vmatpush.msra.mxu3 %v124_v27 }
  0x1b   :  { %230 = vmatpush.msrb.mxu1 %v211_v49 }
  0x1c   :  { %148 = vmatpush.msra.mxu2 %v107_v28  ;;  %168 = vmatpush.msra.mxu3 %v123_v29 }
  0x1d   :  { %231 = vmatpush.msrb.mxu1 %v210_v59 }
  0x1e   :  { %149 = vmatpush.msra.mxu2 %v106_v30  ;;  %169 = vmatpush.msra.mxu3 %v122_v31 }
  0x1f   :  { %232 = vmatpush.msrb.mxu1 %v209_v60 }
  0x20   :  { %150 = vmatpush.msra.mxu2 %v105_v32  ;;  %170 = vmatpush.msra.mxu3 %v121_v33 }
  0x21   :  { %233 = vmatpush.msrb.mxu1 %v208_v61 }
  0x22   :  { %151 = vmatpush.msra.mxu2 %v104_v36  ;;  %171 = vmatpush.msra.mxu3 %v120_v37 }
  0x23   :  { %234 = vmatpush.msrb.mxu1 %v207_v62 }
  0x24   :  { %152 = vmatpush.msra.mxu2 %v103_v38  ;;  %172 = vmatpush.msra.mxu3 %v119_v39 }
  0x25   :  { %235 = vmatpush.msrb.mxu1 %v206_v63 }
  0x26   :  { %153 = vmatpush.msra.mxu2 %v102_v40  ;;  %173 = vmatpush.msra.mxu3 %v118_v41 }
  0x74   :  { %v39_v34 = vpop.permute.xlu0 %38 }
  0x75   :  { %42 = vst.msk [vmem:[#allocation2] sm:$0xff] %vm41_vm1, %v39_v34 }
  0x7c   :  { %v43_v35 = vld [vmem:[#allocation2] sm:$0xff] }
  0x7d   :  { %270 = vmatmul.msk.f32.vlgmr.msra.gmra.mxu0 %vm56_vm2, %v43_v35  ;;  %271 = vmatmul.msk.f32.vlgmr.msra.gmra.mxu1 %vm56_vm2, %v43_v35 }
  0x85   :  { %272 = vmatmul.msk.f32.vlgmr.msrb.gmra.mxu0 %vm34_vm0, %v178_v44 }
  0xfa   :  { %v77_v53 = vpop.f32.mrf.mxu0  ;;  %v97_v54 = vpop.f32.mrf.mxu1 }
  0xfb   :  { %v78_v55 = vadd.f32 %v77_v53, %v52_v51  ;;  %v98_v56 = vadd.f32 %v97_v54, %v53_v52 }
  0xfd   :  { %v100_v57 = vmax.f32 %v78_v55, 0.0  ;;  %v101_v58 = vmax.f32 %v98_v56, 0.0 }
  0xff   :  { %154 = vmatmul.f32.vlgmr.msra.gmra.mxu2 %v100_v57  ;;  %174 = vmatmul.f32.vlgmr.msra.gmra.mxu3 %v101_v58 }
 0x102   :  { %v201_v4 = vpop.f32.mrf.mxu0 }
 0x182   :  { %v155_v1 = vpop.f32.mrf.mxu2  ;;  %v175_v3 = vpop.f32.mrf.mxu3 }
 0x183   :  { %v156_v2 = vadd.f32 %v276_v0, %v155_v1 }
 0x185   :  { %v176_v5 = vadd.f32 %v175_v3, %v156_v2 }
 0x187   :  { %v204_v6 = vsub.f32 %v201_v4, %v176_v5 }
 0x189   :  { %v205_v7 = vmul.f32 %v204_v6, %v204_v6 }
 0x18b   :  { %273 = vmatmul.msk.f32.vlgmr.msrb.gmra.mxu1 %vm216_vm3, %v205_v7 }
 0x208   :  { %v237_v8 = vpop.f32.mrf.mxu1 }
 0x209   :  { %277 = vrsqrt.f32 %v237_v8  ;;  %vm247_vm4 = vcmp.eq.f32.partialorder %v237_v8, inf  ;;  %v250_v16 = vand.u32 2147483648, %v237_v8  ;;  %vm249_vm6 = vcmp.eq.f32.partialorder %v237_v8, 0.0 }
 0x20f   :  { %v278_v9 = vpop.eup %277 }
 0x210   :  { %v241_v10 = vmul.f32 %v278_v9, %v237_v8 }
 0x212   :  { %v242_v11 = vmul.f32 %v278_v9, %v241_v10 }
 0x214   :  { %v243_v12 = vmul.f32 0.5, %v242_v11 }
 0x216   :  { %v244_v13 = vsub.f32 1.5, %v243_v12 }
 0x218   :  { %v245_v14 = vmul.f32 %v278_v9, %v244_v13 }
 0x21a   :  { %v246_v15 = vmul.f32 %v245_v14, %v237_v8 }
 0x21c   :  { %v248_v17 = vsel %vm247_vm4, %v237_v8, %v246_v15 }
 0x21d   :  { %v251_v18 = vsel %vm249_vm6, %v250_v16, %v248_v17 }
 0x21e   :  { %253 = vst.msk [vmem:[#allocation3] sm:$0xff] %vm252_vm5, %v251_v18 }
 0x21f   :  { %264 = dma.vmem_to_hbm [thread:$0]  %s260_s0, 128, %s262_s20, [#allocation4]  }
 0x220   :  { %303 = dma.done.wait [#allocation4], 128  }
 0x221   :  { %304 = vsyncadd [#allocation4], 4294967168 }
 0x222   :  { %269 = vsyncpa [#allocation4], 1 }

</bundles_post_ra>
